<compile_context>
chip_gen: v7x
topology: tpu7x:2x2x1
jax: 0.10.0
libtpu: 0.0.40
codegen_flags: <defaults>
</compile_context>

<pallas_src>
from functools import partial

import jax
import jax.numpy as jnp
import numpy as np
from jax import lax
from jax.experimental import pallas as pl
from jax.experimental.pallas import tpu as pltpu


def _downsample_conv_kernel(x_ref, w_ref, b_ref, o_ref, xt_ref, carry_ref,
                            *, mxu_dtype):
    # x_ref:     (nb, C, 2*MT)  input block (x.dtype)
    # w_ref:     (3, C, C)      [W[:,:,1].T, W[:,:,2].T, W[:,:,0].T] in mxu_dtype
    # b_ref:     (1, C)         f32
    # o_ref:     (nb, C, MT)    output block
    # xt_ref:    (nb, 2*MT, C)  f32 scratch (length on sublanes -> strided reads)
    # carry_ref: (nb, 1, C)     f32 scratch: last odd sample of previous L tile
    nb, c, lt = x_ref.shape
    mt = lt // 2
    j = pl.program_id(1)

    @pl.when(j == 0)
    def _():
        carry_ref[...] = jnp.zeros_like(carry_ref)

    w_even = w_ref[0]      # tap W[:, :, 1]  -> x[2m]
    w_odd = w_ref[1]       # tap W[:, :, 2]  -> x[2m+1]
    w_prev = w_ref[2]      # tap W[:, :, 0]  -> x[2m-1]
    b_row = b_ref[...]     # (1, C) f32
    row0 = lax.broadcasted_iota(jnp.int32, (mt, c), 0) == 0

    for b in range(nb):
        xb = xt_ref.at[b]
        cb = carry_ref.at[b]
        # One XLU transpose per batch element puts the length axis on
        # sublanes; the even/odd de-interleave is then two native 32-bit
        # sublane-strided reads (no concatenate, no extra block copies).
        xb[...] = x_ref[b].astype(jnp.float32).T           # (2*MT, C)
        even = xb[pl.ds(0, mt, stride=2), :]                # x[:, 2m]    (MT, C)
        odd = xb[pl.ds(1, mt, stride=2), :]                 # x[:, 2m+1]  (MT, C)
        # x[:, 2m-1]: roll odd down one row (XLU) and fix row 0 with the
        # carried last odd sample of the previous L tile (zero at tile 0).
        prev = jnp.where(row0, cb[...], pltpu.roll(odd, shift=1, axis=0))
        cb[...] = odd[mt - 1:mt, :]                          # carry for tile j+1

        # Three accumulating MXU calls, f32 accumulation throughout.
        acc = jnp.dot(even.astype(mxu_dtype), w_even,
                      preferred_element_type=jnp.float32)
        acc = acc + jnp.dot(odd.astype(mxu_dtype), w_odd,
                            preferred_element_type=jnp.float32)
        acc = acc + jnp.dot(prev.astype(mxu_dtype), w_prev,
                            preferred_element_type=jnp.float32)
        acc = acc + b_row
        o_ref[b] = acc.T.astype(o_ref.dtype)                 # NCL output block


def _tile_vmem_bytes(nb, c, mt, x_itemsize, out_itemsize):
    """Per-grid-step VMEM that scales with the L tile (double-buffered I/O
    blocks, scratch, and f32 working set); excludes constant weight/bias."""
    lt = 2 * mt
    dma = 2 * nb * c * lt * x_itemsize + 2 * nb * c * mt * out_itemsize
    scratch = nb * lt * c * 4 + nb * c * 4                 # xt + carry (f32)
    working = 5 * nb * mt * c * 4                           # even/odd/prev/acc/tmp
    return dma + scratch + working


def _fixed_vmem_bytes(c, w_itemsize):
    # Constant-index-map inputs are still double buffered by the pipeline.
    return 2 * (3 * c * c * w_itemsize) + 2 * (c * 4)


def _pick_m_tile(m, nb, c, x_itemsize, out_itemsize, tile_budget):
    """Largest M tile that (a) divides M, (b) keeps the tiled block dims
    lane-aligned (multiple of 128, or the full extent), (c) fits the budget."""
    cands = [d for d in range(128, min(m, 4096) + 1, 128) if m % d == 0]
    fitting = [d for d in sorted(cands, reverse=True)
               if _tile_vmem_bytes(nb, c, d, x_itemsize, out_itemsize)
               <= tile_budget]
    if fitting:
        capped = [d for d in fitting if d <= 1024]   # keep several grid steps
        return capped[0] if capped else fitting[-1]
    if cands:
        return cands[-1]        # smallest aligned tile; budget is advisory
    return m                    # short / unaligned lengths: single L tile


def downsample_conv(x, weight, bias, *, batch_block=1, m_tile=None,
                    compute_dtype=None, vmem_budget_bytes=None):
    """Conv1d(dim, dim, kernel_size=3, stride=2, padding=1).

    x: (N, C, L); weight: (C, C, 3) PyTorch Conv1d layout; bias: (C,).
    Returns (N, C, L // 2) in x.dtype.  compute_dtype (e.g. bf16) sets the
    MXU operand dtype; accumulation is always f32.
    """
    n, c, l = x.shape
    assert l % 2 == 0, "kernel assumes an even input length"
    assert weight.shape == (c, c, 3)
    assert bias.shape == (c,)
    assert n % batch_block == 0
    m = l // 2
    nb = batch_block

    out_dtype = x.dtype
    cdt = jnp.dtype(compute_dtype) if compute_dtype is not None \
        else jnp.dtype(x.dtype)
    x_isz = jnp.dtype(x.dtype).itemsize
    o_isz = jnp.dtype(out_dtype).itemsize

    # Per-generation VMEM budget: ~1/5 of physical VMEM per TensorCore
    # (v5e/v6e 128 MiB -> ~25 MiB, v7x 64 MiB -> ~12 MiB).
    if vmem_budget_bytes is None:
        try:
            phys = pltpu.get_tpu_info().vmem_capacity_bytes
        except Exception:
            phys = 64 << 20           # assume the smallest generation (v7x)
        vmem_budget_bytes = phys // 5

    fixed = _fixed_vmem_bytes(c, cdt.itemsize)
    tile_budget = max(vmem_budget_bytes - fixed, 2 << 20)
    if m_tile is None:
        m_tile = _pick_m_tile(m, nb, c, x_isz, o_isz, tile_budget)
    assert m % m_tile == 0
    assert m_tile == m or m_tile % 128 == 0, (
        "m_tile must be a multiple of 128 (lane-aligned blocks) or the full "
        "output length")
    l_tile = 2 * m_tile
    n_ltiles = m // m_tile

    # Tap matrices, transposed so (M, Cin) @ (Cin, Cout) keeps channels on
    # lanes.  Order matches [even, odd, prev]: W[:,:,1], W[:,:,2], W[:,:,0].
    w_stack = jnp.stack(
        [weight[:, :, 1].T, weight[:, :, 2].T, weight[:, :, 0].T],
        axis=0).astype(cdt)                                   # (3, C, C)
    b_row = bias.reshape(1, c).astype(jnp.float32)            # (1, C)

    est_vmem = fixed + _tile_vmem_bytes(nb, c, m_tile, x_isz, o_isz)
    vmem_limit = int(min(max(est_vmem * 5 // 4, 32 << 20), 60 << 20))

    flops = 2 * n * m * (3 * c) * c
    bytes_accessed = int(x.size * x_isz + w_stack.size * cdt.itemsize
                         + b_row.size * 4 + n * c * m * o_isz)

    kernel = partial(_downsample_conv_kernel, mxu_dtype=cdt)

    return pl.pallas_call(
        kernel,
        out_shape=jax.ShapeDtypeStruct((n, c, m), out_dtype),
        grid=(n // nb, n_ltiles),
        in_specs=[
            pl.BlockSpec((nb, c, l_tile), lambda i, j: (i, 0, j)),
            pl.BlockSpec((3, c, c), lambda i, j: (0, 0, 0)),
            pl.BlockSpec((1, c), lambda i, j: (0, 0)),
        ],
        out_specs=pl.BlockSpec((nb, c, m_tile), lambda i, j: (i, 0, j)),
        scratch_shapes=[
            pltpu.VMEM((nb, l_tile, c), jnp.float32),   # transposed input tile
            pltpu.VMEM((nb, 1, c), jnp.float32),        # cross-tile odd carry
        ],
        compiler_params=pltpu.CompilerParams(
            # Batch blocks are independent (megacore-parallel); the L-tile
            # axis must stay sequential ("arbitrary") for the halo carry.
            dimension_semantics=("parallel", "arbitrary"),
            vmem_limit_bytes=vmem_limit),
        cost_estimate=pl.CostEstimate(
            flops=flops, transcendentals=0, bytes_accessed=bytes_accessed),
    )(x, w_stack, b_row)


def _reference(x, weight, bias):
    """Pure-JAX reference: Conv1d(k=3, s=2, p=1) + bias."""
    y = lax.conv_general_dilated(
        x.astype(jnp.float32), weight.astype(jnp.float32),
        window_strides=(2,), padding=[(1, 1)],
        dimension_numbers=("NCH", "OIH", "NCH"))
    return y + bias.reshape(1, -1, 1).astype(jnp.float32)


def _make_inputs(key, n, c, l):
    kx, kw, kb = jax.random.split(key, 3)
    bound = 1.0 / np.sqrt(c * 3)     # PyTorch Conv1d default init bound
    x = jax.random.normal(kx, (n, c, l), dtype=jnp.float32)
    w = jax.random.uniform(kw, (c, c, 3), jnp.float32, -bound, bound)
    b = jax.random.uniform(kb, (c,), jnp.float32, -bound, bound)
    return x, w, b


if __name__ == "__main__":
    root = jax.random.PRNGKey(0)
    k1, k2 = jax.random.split(root)

    # 1) Small single-L-tile case; batch_block=1 (2 parallel grid steps over
    #    the batch) and batch_block=2 (one fused step).
    x, w, b = _make_inputs(k1, 2, 8, 16)
    y_ref = jax.block_until_ready(_reference(x, w, b))
    for nbatch in (1, 2):
        y = jax.block_until_ready(downsample_conv(x, w, b, batch_block=nbatch))
        assert y.shape == (2, 8, 8), y.shape
        np.testing.assert_allclose(np.asarray(y), np.asarray(y_ref),
                                   rtol=1e-5, atol=1e-5)

    # 2) Multi-L-tile case (m_tile=128 -> 2 sequential L tiles per batch):
    #    exercises the cross-tile halo carry for the x[2m-1] tap.
    x2, w2, b2 = _make_inputs(k2, 2, 8, 512)
    y2_ref = jax.block_until_ready(_reference(x2, w2, b2))
    y2 = jax.block_until_ready(downsample_conv(x2, w2, b2, m_tile=128))
    assert y2.shape == (2, 8, 256), y2.shape
    np.testing.assert_allclose(np.asarray(y2), np.asarray(y2_ref),
                               rtol=1e-5, atol=1e-5)

    # 3) bf16 inputs + bf16 MXU operands (f32 accumulation): halves input DMA
    #    bytes and uses the fast MXU path; tolerance loosened accordingly.
    y3 = jax.block_until_ready(
        downsample_conv(x2.astype(jnp.bfloat16), w2, b2, m_tile=128,
                        compute_dtype=jnp.bfloat16))
    np.testing.assert_allclose(np.asarray(y3.astype(jnp.float32)),
                               np.asarray(y2_ref), rtol=5e-2, atol=5e-2)

    print("KERNEL_OK")
</pallas_src>

<mosaic_0001>
module attributes {stable_mosaic.version = 11 : i64} {
  func.func @_downsample_conv_kernel(%arg0: i32, %arg1: i32, %arg2: memref<1x8x16xf32, #tpu.memory_space<vmem>>, %arg3: memref<3x8x8xf32, #tpu.memory_space<vmem>>, %arg4: memref<1x8xf32, #tpu.memory_space<vmem>>, %arg5: memref<1x8x8xf32, #tpu.memory_space<vmem>>, %arg6: memref<1x16x8xf32, #tpu.memory_space<vmem>>, %arg7: memref<1x1x8xf32, #tpu.memory_space<vmem>>) attributes {dimension_semantics = [#tpu.dimension_semantics<parallel>, #tpu.dimension_semantics<arbitrary>], iteration_bounds = array<i64: 2, 1>, scalar_prefetch = 0 : i64, scratch_operands = 2 : i64, tpu.core_type = #tpu.core_type<tc>, window_params = [{transform_indices = @transform_0, window_bounds = array<i64: 1, 8, 16>}, {pipeline_mode = #tpu.pipeline_mode<synchronous>, transform_indices = @transform_1, window_bounds = array<i64: 3, 8, 8>}, {pipeline_mode = #tpu.pipeline_mode<synchronous>, transform_indices = @transform_2, window_bounds = array<i64: 1, 8>}, {transform_indices = @transform_3, window_bounds = array<i64: 1, 8, 8>}]} {
    %c0_i32 = arith.constant 0 : i32
    %0 = arith.cmpi eq, %arg1, %c0_i32 : i32
    %1 = arith.extui %0 : i1 to i32
    %c0_i32_0 = arith.constant 0 : i32
    %2 = arith.cmpi ne, %1, %c0_i32_0 : i32
    scf.if %2 {
      %cst_37 = arith.constant 0.000000e+00 : f32
      %46 = vector.broadcast %cst_37 : f32 to vector<1x1x8xf32>
      %c0_38 = arith.constant 0 : index
      %c0_39 = arith.constant 0 : index
      %c0_40 = arith.constant 0 : index
      %47 = vector.load %arg7[%c0_38, %c0_39, %c0_40] : memref<1x1x8xf32, #tpu.memory_space<vmem>>, vector<1x1x8xf32>
      tpu.vector_store %arg7[%c0_38, %c0_39, %c0_40], %46 {strides = array<i32>} : memref<1x1x8xf32, #tpu.memory_space<vmem>>, vector<1x1x8xf32>,
    } else {
    }
    %c0 = arith.constant 0 : index
    %c0_1 = arith.constant 0 : index
    %c0_2 = arith.constant 0 : index
    %3 = vector.load %arg3[%c0, %c0_1, %c0_2] : memref<3x8x8xf32, #tpu.memory_space<vmem>>, vector<1x8x8xf32>
    %4 = vector.shape_cast %3 : vector<1x8x8xf32> to vector<8x8xf32>
    %c1 = arith.constant 1 : index
    %c0_3 = arith.constant 0 : index
    %c0_4 = arith.constant 0 : index
    %5 = vector.load %arg3[%c1, %c0_3, %c0_4] : memref<3x8x8xf32, #tpu.memory_space<vmem>>, vector<1x8x8xf32>
    %6 = vector.shape_cast %5 : vector<1x8x8xf32> to vector<8x8xf32>
    %c2 = arith.constant 2 : index
    %c0_5 = arith.constant 0 : index
    %c0_6 = arith.constant 0 : index
    %7 = vector.load %arg3[%c2, %c0_5, %c0_6] : memref<3x8x8xf32, #tpu.memory_space<vmem>>, vector<1x8x8xf32>
    %8 = vector.shape_cast %7 : vector<1x8x8xf32> to vector<8x8xf32>
    %c0_7 = arith.constant 0 : index
    %c0_8 = arith.constant 0 : index
    %9 = vector.load %arg4[%c0_7, %c0_8] : memref<1x8xf32, #tpu.memory_space<vmem>>, vector<1x8xf32>
    %10 = tpu.iota {dimensions = array<i32: 0>} : vector<8x8xi32>
    %c0_i32_9 = arith.constant 0 : i32
    %11 = vector.broadcast %c0_i32_9 : i32 to vector<8x8xi32>
    %12 = arith.cmpi eq, %10, %11 : vector<8x8xi32>
    %c0_10 = arith.constant 0 : index
    %c0_11 = arith.constant 0 : index
    %c0_12 = arith.constant 0 : index
    %13 = vector.load %arg2[%c0_10, %c0_11, %c0_12] : memref<1x8x16xf32, #tpu.memory_space<vmem>>, vector<1x8x16xf32>
    %14 = vector.shape_cast %13 : vector<1x8x16xf32> to vector<8x16xf32>
    %15 = tpu.transpose %14, [1, 0] : vector<8x16xf32> -> vector<16x8xf32>
    %c0_13 = arith.constant 0 : index
    %c0_14 = arith.constant 0 : index
    %c0_15 = arith.constant 0 : index
    %16 = vector.load %arg6[%c0_13, %c0_14, %c0_15] : memref<1x16x8xf32, #tpu.memory_space<vmem>>, vector<1x16x8xf32>
    %17 = vector.shape_cast %16 : vector<1x16x8xf32> to vector<16x8xf32>
    %18 = vector.shape_cast %15 : vector<16x8xf32> to vector<1x16x8xf32>
    tpu.vector_store %arg6[%c0_13, %c0_14, %c0_15], %18 {strides = array<i32>} : memref<1x16x8xf32, #tpu.memory_space<vmem>>, vector<1x16x8xf32>,
    %c0_i32_16 = arith.constant 0 : i32
    %c0_i32_17 = arith.constant 0 : i32
    %c0_i32_18 = arith.constant 0 : i32
    %19 = tpu.memref_slice %arg6[%c0_i32_16, %c0_i32_17, %c0_i32_18] : memref<1x16x8xf32, #tpu.memory_space<vmem>> -> memref<1x16x8xf32, #tpu.memory_space<vmem>>
    %20 = tpu.memref_squeeze %19 : memref<1x16x8xf32, #tpu.memory_space<vmem>> -> memref<16x8xf32, #tpu.memory_space<vmem>>
    %c0_19 = arith.constant 0 : index
    %c0_20 = arith.constant 0 : index
    %21 = tpu.strided_load %20[%c0_19, %c0_20] {strides = array<i32: 2, 1>} : memref<16x8xf32, #tpu.memory_space<vmem>>, vector<8x8xf32>
    %c0_i32_21 = arith.constant 0 : i32
    %c0_i32_22 = arith.constant 0 : i32
    %c0_i32_23 = arith.constant 0 : i32
    %22 = tpu.memref_slice %arg6[%c0_i32_21, %c0_i32_22, %c0_i32_23] : memref<1x16x8xf32, #tpu.memory_space<vmem>> -> memref<1x16x8xf32, #tpu.memory_space<vmem>>
    %23 = tpu.memref_squeeze %22 : memref<1x16x8xf32, #tpu.memory_space<vmem>> -> memref<16x8xf32, #tpu.memory_space<vmem>>
    %c1_24 = arith.constant 1 : index
    %c0_25 = arith.constant 0 : index
    %24 = tpu.strided_load %23[%c1_24, %c0_25] {strides = array<i32: 2, 1>} : memref<16x8xf32, #tpu.memory_space<vmem>>, vector<8x8xf32>
    %c0_26 = arith.constant 0 : index
    %c0_27 = arith.constant 0 : index
    %c0_28 = arith.constant 0 : index
    %25 = vector.load %arg7[%c0_26, %c0_27, %c0_28] : memref<1x1x8xf32, #tpu.memory_space<vmem>>, vector<1x1x8xf32>
    %26 = vector.shape_cast %25 : vector<1x1x8xf32> to vector<1x8xf32>
    %c1_i32 = arith.constant 1 : i32
    %27 = tpu.dynamic_rotate %24 by %c1_i32 dim 0 : vector<8x8xf32>, i32 -> vector<8x8xf32>
    %28 = vector.shape_cast %26 : vector<1x8xf32> to vector<1x8xf32>
    %29 = vector.broadcast %28 : vector<1x8xf32> to vector<8x8xf32>
    %30 = arith.select %12, %29, %27 : vector<8x8xi1>, vector<8x8xf32>
    %31 = vector.extract_strided_slice %24 {offsets = [7, 0], sizes = [1, 8], strides = [1, 1]} : vector<8x8xf32> to vector<1x8xf32>
    %c0_29 = arith.constant 0 : index
    %c0_30 = arith.constant 0 : index
    %c0_31 = arith.constant 0 : index
    %32 = vector.load %arg7[%c0_29, %c0_30, %c0_31] : memref<1x1x8xf32, #tpu.memory_space<vmem>>, vector<1x1x8xf32>
    %33 = vector.shape_cast %32 : vector<1x1x8xf32> to vector<1x8xf32>
    %34 = vector.shape_cast %31 : vector<1x8xf32> to vector<1x1x8xf32>
    tpu.vector_store %arg7[%c0_29, %c0_30, %c0_31], %34 {strides = array<i32>} : memref<1x1x8xf32, #tpu.memory_space<vmem>>, vector<1x1x8xf32>,
    %cst = arith.constant dense<0.000000e+00> : vector<8x8xf32>
    %35 = tpu.matmul %21, %4, %cst {dimension_numbers = #tpu.dot_dimension_numbers<[1], [0], [0], [1], [0, 0, 1, 1], [], []>} : vector<8x8xf32>, vector<8x8xf32>, vector<8x8xf32> -> vector<8x8xf32>
    %cst_32 = arith.constant dense<0.000000e+00> : vector<8x8xf32>
    %36 = tpu.matmul %24, %6, %cst_32 {dimension_numbers = #tpu.dot_dimension_numbers<[1], [0], [0], [1], [0, 0, 1, 1], [], []>} : vector<8x8xf32>, vector<8x8xf32>, vector<8x8xf32> -> vector<8x8xf32>
    %37 = arith.addf %35, %36 : vector<8x8xf32>
    %cst_33 = arith.constant dense<0.000000e+00> : vector<8x8xf32>
    %38 = tpu.matmul %30, %8, %cst_33 {dimension_numbers = #tpu.dot_dimension_numbers<[1], [0], [0], [1], [0, 0, 1, 1], [], []>} : vector<8x8xf32>, vector<8x8xf32>, vector<8x8xf32> -> vector<8x8xf32>
    %39 = arith.addf %37, %38 : vector<8x8xf32>
    %40 = vector.broadcast %9 : vector<1x8xf32> to vector<8x8xf32>
    %41 = arith.addf %39, %40 : vector<8x8xf32>
    %42 = tpu.transpose %41, [1, 0] : vector<8x8xf32> -> vector<8x8xf32>
    %c0_34 = arith.constant 0 : index
    %c0_35 = arith.constant 0 : index
    %c0_36 = arith.constant 0 : index
    %43 = vector.load %arg5[%c0_34, %c0_35, %c0_36] : memref<1x8x8xf32, #tpu.memory_space<vmem>>, vector<1x8x8xf32>
    %44 = vector.shape_cast %43 : vector<1x8x8xf32> to vector<8x8xf32>
    %45 = vector.shape_cast %42 : vector<8x8xf32> to vector<1x8x8xf32>
    tpu.vector_store %arg5[%c0_34, %c0_35, %c0_36], %45 {strides = array<i32>} : memref<1x8x8xf32, #tpu.memory_space<vmem>>, vector<1x8x8xf32>,
    return
  }
  func.func @transform_0(%arg0: i32, %arg1: i32) -> (i32, i32, i32) {
    %c0_i32 = arith.constant 0 : i32
    %c0_i32_0 = arith.constant 0 : i32
    return %arg0, %c0_i32, %arg1 : i32, i32, i32
  }
  func.func @transform_1(%arg0: i32, %arg1: i32) -> (i32, i32, i32) {
    %c0_i32 = arith.constant 0 : i32
    %c0_i32_0 = arith.constant 0 : i32
    %c0_i32_1 = arith.constant 0 : i32
    %c0_i32_2 = arith.constant 0 : i32
    return %c0_i32, %c0_i32_0, %c0_i32_1 : i32, i32, i32
  }
  func.func @transform_2(%arg0: i32, %arg1: i32) -> (i32, i32) {
    %c0_i32 = arith.constant 0 : i32
    %c0_i32_0 = arith.constant 0 : i32
    %c0_i32_1 = arith.constant 0 : i32
    return %c0_i32, %c0_i32_0 : i32, i32
  }
  func.func @transform_3(%arg0: i32, %arg1: i32) -> (i32, i32, i32) {
    %c0_i32 = arith.constant 0 : i32
    %c0_i32_0 = arith.constant 0 : i32
    return %arg0, %c0_i32, %arg1 : i32, i32, i32
  }
}

</mosaic_0001>

<bundles_post_ra>
// kernel: tpu_custom_call.1
= control target key start
LH: loop header
LB: loop body
LE: loop exit
PB: predicated region body
PF: predicated region fallthrough
CT: control target
= control target key end

     0   :  { %8 = vsyncpa [#allocation5], 0  ;;  %s1169_s0 = inlined_call_operand.hbm [shape: f32[2,8,16], index: 0, kind: input, shape index: {}]   ;;  %s1170_s1 = inlined_call_operand.hbm [shape: f32[3,8,8], index: 1, kind: input, shape index: {}]   ;;  %s1171_s2 = inlined_call_operand.vmem [shape: f32[1,8], index: 2, kind: input, shape index: {}]   ;;  %s1172_s3 = inlined_call_operand.hbm [shape: f32[2,8,8], index: 3, kind: output, shape index: {}]  }
   0x1   :  { %10 = vsyncpa [#allocation5 + $0x1], 0 }
   0x2   :  { %11 = vsyncpa [#allocation8], 0 }
   0x3   :  { %12 = vsyncpa [#allocation6], 0 }
   0x4   :  { %14 = vsyncpa [#allocation6 + $0x1], 0  ;;  %s939_s12 = smov 0   ;;  %s941_s13 = smov 0  }
   0x5   :  { %s943_s14 = smov 0   ;;  %s945_s15 = smov 0  }
   0x6   :  { %s947_s16 = smov 0   ;;  %s949_s17 = smov 0  }
   0x7 LB: > { %s648_s18 = sadd.s32 4294967295, %s910_s17   ;;  %s649_s19 = sadd.s32 4294967294, %s910_s17   ;;  %s910_s17 = sphi %s949_s17, %s20_s17   ;;  %s906_s16 = sphi %s947_s16, %s1196_s16   ;;  %s902_s15 = sphi %s945_s15, %s1195_s15   ;;  %s898_s14 = sphi %s943_s14, %s1194_s14   ;;  %s894_s13 = sphi %s941_s13, %s1193_s13   ;;  %s890_s12 = sphi %s939_s12, %s1192_s12  }
   0x8   : > { %p54_p0 = scmp.ne.s32.totalorder %s894_s13, %s890_s12  ;;  %p973_p1 = scmp.eq.s32.totalorder %s648_s18, 0 }
   0x9   : > { %p977_p2 = scmp.eq.s32.totalorder %s648_s18, 1  ;;  %p128_p3 = scmp.eq.s32.totalorder %s649_s19, 1 }
   0xa   : > { %s1177_s20 = scalar_select %p973_p1, 1, 0 }
   0xb   : > { %s1178_s21 = scalar_select %p977_p2, 1, 0 }
   0xc   : > { %p983_p4 = por %p973_p1, %p54_p0  ;;  %p650_p5 = scmp.ge.s32.totalorder %s910_s17, 1 }
   0xd   : > { %p988_p6 = por %p128_p3, %p54_p0  ;;  %p135_p7 = scmp.lt.s32.totalorder %s910_s17, 3 }
   0xe   : > { %s1179_s22 = scalar_select %p983_p4, 1, 0 }
   0xf   : > { %s1180_s23 = scalar_select %p988_p6, 1, 0 }
  0x10   : > { %p993_p8 = pnand %p650_p5, %p135_p7  ;;  %s912_s25 = smov [#allocation7]  }
  0x11   : > { %s147_s26 = sshll.u32 %s912_s25, 4  ;;  %s32_s28 = sadd.s32 1, %s906_s16  ;;  %s148_s26 = int_to_ptr.vmem [resolvable:$true] %s147_s26 }
  0x12   : > { %s1181_s24 = scalar_select %p993_p8, 1, 0 }
  0x13   : > { %p697_p9 = pneg %p993_p8  ;;  %s766_s4 = scalar_lea.hbm %s1170_s1, 384 }
  0x14   : > { %p767_p12 = scmp.ne.s32.totalorder %s1170_s1, %s766_s4  ;;  %p773_p5 = scmp.lt.u32.totalorder %s766_s4, %s1170_s1 }
  0x15   : > { %p1002_p11 = pnand %p697_p9, %p973_p1 }
  0x17   : > { %p768_p13 = pneg %p1002_p11 }
  0x19   : > { %p769_p0 = pnand %p768_p13, %p767_p12 }
  0x1b   : > { %p770_p3 = pneg %p769_p0 }
  0x1d   : > { %p775_p7 = pnand %p773_p5, %p770_p3 }
  0x1f   : > { %778 = shalt.err (!%p775_p7)
}
  0x20   : > { %s779_s9 = scalar_lea.vmem %s148_s26, 384  ;;  %p787_p1 = scmp.lt.s32.totalorder %s148_s26, %s148_s26 }
  0x21   : > { %p780_p9 = scmp.ne.s32.totalorder %s148_s26, %s779_s9  ;;  %p788_p4 = scmp.lt.s32.totalorder %s779_s9, %s779_s9 }
  0x23   : > { %p782_p10 = pnand %p780_p9, %p768_p13  ;;  %p789_p8 = por %p788_p4, %p787_p1 }
  0x25   : > { %p783_p6 = pneg %p782_p10 }
  0x27   : > { %p790_p2 = pnand %p789_p8, %p783_p6 }
  0x29   : > { %793 = shalt.err (!%p790_p2)
}
  0x2a   : > { %s913_s10 = smov 128   ;;  %s914_s11 = smov 8  }
  0x2b   : > { %700 = dma.hbm_to_vmem [thread:$0]  (!%p1002_p11), %s1170_s1, 384, %s148_s26, [#allocation8], %s913_s10, %s913_s10, %s914_s11  }
  0x2c   : > { %p34_p1 = scmp.ge.s32.totalorder %s32_s28, 2  ;;  %s41_s25 = sadd.s32 1, %s898_s14 }
  0x2d   : > { %p48_p2 = scmp.ne.s32.totalorder %s898_s14, %s894_s13  ;;  %p49_p4 = scmp.eq.s32.totalorder %s910_s17, 0 }
  0x2e   : > { %s1198_s28 = smov (%p34_p1, %s32_s28), 0  ;;  %p1184_p8 = scmp.ne.s32.totalorder %s1178_s21, 0 }
  0x2f   : > { %p1029_p6 = por %p49_p4, %p48_p2  ;;  %s36_s27 = ssub.s32 %s906_s16, %s1198_s28 }
  0x30   : > { %p1035_p10 = por %p1184_p8, %p48_p2  ;;  %p710_p12 = scmp.lt.s32.totalorder %s910_s17, 2 }
  0x31   : > { %p39_p11 = scmp.eq.s32.totalorder %s36_s27, 0  ;;  %s164_s26 = sand.u32 1, %s898_s14  }
  0x32   : > { %s653_s4 = sshll.u32 %s164_s26, 3  ;;  %s654_s6 = sshll.u32 %s906_s16, 7 }
  0x33   : > { %s1044_s5 = scalar_select %p39_p11, %s898_s14, %s41_s25  }
  0x34   : > { %s1050_s9 = scalar_lea.hbm %s1169_s0, %s654_s6  ;;  %s168_s21 = scalar_lea.vmem [#allocation4], %s653_s4 }
  0x35   : > { %s176_s10 = sshll.u32 %s168_s21, 4  ;;  %p1056_p13 = pnand %p710_p12, %p1029_p6  ;;  %s1052_s10 = int_to_ptr.vmem [resolvable:$true] %s176_s10 }
  0x36   : > { %s165_s18 = scalar_lea.sflag [#allocation5], %s164_s26  ;;  %s794_s19 = scalar_lea.hbm %s1050_s9, 128 }
  0x37   : > { %p795_p0 = scmp.ne.s32.totalorder %s1050_s9, %s794_s19  ;;  %p796_p3 = pneg %p1056_p13 }
  0x38   : > { %s799_s4 = scalar_lea.hbm %s1169_s0, 256  ;;  %p800_p9 = scmp.lt.u32.totalorder %s1050_s9, %s1169_s0 }
  0x39   : > { %p797_p5 = pnand %p796_p3, %p795_p0  ;;  %p801_p1 = scmp.lt.u32.totalorder %s799_s4, %s794_s19 }
  0x3a   : > { %p803_p4 = scmp.lt.u32.totalorder %s794_s19, %s1050_s9 }
  0x3b   : > { %p798_p7 = pneg %p797_p5  ;;  %p802_p2 = por %p801_p1, %p800_p9 }
  0x3d   : > { %p804_p6 = por %p803_p4, %p802_p2 }
  0x3f   : > { %p805_p8 = pnand %p804_p6, %p798_p7 }
  0x41   : > { %808 = shalt.err (!%p805_p8)
}
  0x42   : > { %s809_s26 = scalar_lea.vmem %s1052_s10, 128  ;;  %s915_s7 = smov [#allocation4]  }
  0x43   : > { %p810_p12 = scmp.ne.s32.totalorder %s1052_s10, %s809_s26  ;;  %s814_s8 = sshll.u32 %s915_s7, 4  ;;  %s815_s8 = int_to_ptr.vmem [resolvable:$false] %s814_s8 }
  0x44   : > { %s816_s21 = scalar_lea.vmem %s815_s8, 256  ;;  %p817_p5 = scmp.lt.s32.totalorder %s1052_s10, %s815_s8 }
  0x45   : > { %p812_p11 = pnand %p810_p12, %p796_p3  ;;  %p818_p9 = scmp.lt.s32.totalorder %s816_s21, %s809_s26 }
  0x47   : > { %p813_p0 = pneg %p812_p11  ;;  %p819_p1 = por %p818_p9, %p817_p5 }
  0x49   : > { %p820_p2 = pnand %p819_p1, %p813_p0 }
  0x4b   : > { %823 = shalt.err (!%p820_p2)
}
  0x4c   : > { %704 = dma.hbm_to_vmem [thread:$0]  (!%p1056_p13), %s1050_s9, 128, %s1052_s10, %s165_s18  }
  0x4d   : > { %p1187_p7 = scmp.ne.s32.totalorder %s1181_s24, 0 }
  0x4e   : > { %s1088_s19 = sand.u32 (!%p1187_p7), 1, %s894_s13   ;;  %p1188_p3 = scmp.ne.s32.totalorder (!%p1187_p7), %s1179_s22, 0 }
  0x4f   : > { %185 = sbr.rel (%p1187_p7) target bundleno = 595 (0x253), region = 32  ;;  %s656_s25 = sshll.u32 (!%p1187_p7), %s1088_s19, 3 }
  0x50   : > { %s188_s27 = scalar_lea.sflag (!%p1187_p7), [#allocation5], %s1088_s19  ;;  %s191_s4 = scalar_lea.vmem (!%p1187_p7), [#allocation4], %s656_s25 }
  0x56   : > { %877 = dma.done.wait (%p1188_p3), %s188_s27, 128  }
  0x57   : > { %879 = vsyncadd (%p1188_p3), %s188_s27, 4294967168  ;;  %p1189_p13 = scmp.ne.s32.totalorder %s1177_s20, 0 }
  0x59   : > { %881 = dma.done.wait (%p1189_p13), [#allocation8], 384  }
  0x5a   : > { %883 = vsyncadd (%p1189_p13), [#allocation8], 4294966912  ;;  %v233_v0 = vld [vmem:[%s191_s4] sm:$0xff]  ;;  %vm222_vm0 = vcmask 57344   ;;  %v916_v1 = vmov 0.0   ;;  %v226_v2 = vld [vmem:[#allocation7 + $0x8] sm:$0xff]  ;;  %v230_v6 = vlaneseq }
  0x5b   : > { %234 = vxpose.xlu0.b32.start.end [1/1] (short) (narrow) %v233_v0, 16  ;;  %674 = vmatprep.subr.mxu0 %v916_v1  ;;  %v224_v3 = vld [vmem:[#allocation7] sm:$0xff]  ;;  %223 = vst.msk [vmem:[#allocation3] sm:$0x1] %vm222_vm0, %v916_v1  ;;  %vm917_vm1 = vmmov 0   ;;  %vm266_vm2 = vcmask 64512  }
  0x5c   : > { %679 = vmatprep.subr.mxu1 %v916_v1  ;;  %675 = vmatpush3.msra.mxu0 %v226_v2  ;;  %v231_v7 = vshrl.u32 %v230_v6, 7  ;;  %vm281_vm3 = vcmask 64519   ;;  %v228_v9 = vld [vmem:[#allocation7 + $0x10] sm:$0xff]  ;;  %v663_v20 = vld [vmem:[%s1171_s2] ss:$0 sm:$0xff]  ;;  %s665_s24 = sshll.u32 %s902_s15, 7 }
  0x5d   : > { %676 = vmatprep.mubr.msk.f32.mxu0 %vm917_vm1, %v916_v1  ;;  %680 = vmatpush3.msra.mxu1 %v224_v3  ;;  %s217_s9 = scalar_lea.vmem [#allocation9], %s656_s25  ;;  %s1119_s29 = scalar_lea.hbm %s1172_s3, %s665_s24 }
  0x5e   : > { %681 = vmatprep.mubr.msk.f32.mxu1 %vm917_vm1, %v916_v1  ;;  %684 = vmatprep.subr.mxu0 %v916_v1  ;;  %vm232_vm4 = vcmp.eq.s32.totalorder %v231_v7, 0  ;;  %s558_s10 = sshll.u32 %s217_s9, 4  ;;  %s544_s6 = scalar_lea.sflag [#allocation6], %s1088_s19  ;;  %s1121_s10 = int_to_ptr.vmem [resolvable:$true] %s558_s10 }
  0x5f   : > { %s824_s26 = scalar_lea.vmem %s1121_s10, 128  ;;  %s918_s15 = smov [#allocation9]  }
  0x60   : > { %p825_p4 = scmp.ne.s32.totalorder %s1121_s10, %s824_s26  ;;  %s828_s7 = sshll.u32 %s918_s15, 4  ;;  %s829_s7 = int_to_ptr.vmem [resolvable:$false] %s828_s7 }
  0x61   : > { %s830_s8 = scalar_lea.vmem %s829_s7, 256  ;;  %p831_p12 = scmp.lt.s32.totalorder %s1121_s10, %s829_s7 }
  0x62   : > { %v659_v8 = vld [vmem:[#allocation3] ss:$0 sm:$0xff]  ;;  %p826_p6 = pnand %p825_p4, %p1035_p10  ;;  %p832_p11 = scmp.lt.s32.totalorder %s830_s8, %s824_s26 }
  0x64   : > { %p827_p8 = pneg %p826_p6  ;;  %p833_p0 = por %p832_p11, %p831_p12 }
  0x66   : > { %p834_p5 = pnand %p833_p0, %p827_p8 }
  0xdb   : > { %v250_v4 = vpop.trf.xlu0 }
  0xdc   : > { %267 = vst.msk [vmem:[#allocation2] sm:$0xff] %vm266_vm2, %v250_v4 }
  0xdf   : > { %v251_v5 = vpop.trf.xlu0 }
  0xe0   : > { %268 = vst.msk [vmem:[#allocation2 + $0x8] sm:$0xff] %vm266_vm2, %v251_v5 }
  0xe7   : > { %v271_v10 = vld [vmem:[#allocation2 + $0x1] ss:$2 sm:$0xff]  ;;  %v269_v11 = vld [vmem:[#allocation2] ss:$2 sm:$0xff] }
  0xe8   : > { %v273_v12 = vrot.slane %v271_v10, 7  ;;  %677 = vmatmul.mubr.msk.f32.vlgmr.msra.gmra.mrb[0].mxu0 %vm266_vm2, %v271_v10  ;;  %682 = vmatmul.mubr.msk.f32.vlgmr.msra.gmra.mrb[0].mxu1 %vm266_vm2, %v269_v11  ;;  %282 = vst.msk [vmem:[#allocation3 - $0x7] sm:$0x80] %vm281_vm3, %v271_v10 }
  0xe9   : > { %685 = vmatpush3.msra.mxu0 %v228_v9  ;;  %686 = vmatprep.mubr.msk.f32.mxu0 %vm917_vm1, %v916_v1 }
  0xea   : > { %v280_v13 = vsel %vm232_vm4, %v659_v8, %v273_v12 }
  0xec   : > { %687 = vmatmul.mubr.msk.f32.vlgmr.msra.gmra.mrb[2].mxu0 %vm266_vm2, %v280_v13 }
 0x1bb   : > { %v352_v14 = vpop.f32.mrb[0].mxu0  ;;  %v425_v15 = vpop.f32.mrb[0].mxu1 }
 0x1bc   : > { %v426_v16 = vadd.f32 %v425_v15, %v352_v14  ;;  %v678_v17 = vpop.f32.mrb[1].mxu0  ;;  %v683_v18 = vpop.f32.mrb[1].mxu1 }
 0x1bf   : > { %v498_v19 = vpop.f32.mrb[2].mxu0 }
 0x1c0   : > { %v502_v21 = vadd.f32 %v498_v19, %v426_v16  ;;  %v688_v22 = vpop.f32.mrb[3].mxu0 }
 0x1c2   : > { %v509_v23 = vadd.f32 %v663_v20, %v502_v21 }
 0x1c4   : > { %510 = vxpose.xlu0.b32.start.end [1/1] (short) (narrow) %v509_v23, 8 }
 0x244   : > { %v526_v24 = vpop.trf.xlu0 }
 0x245   : > { %542 = vst.msk [vmem:[%s217_s9] sm:$0xff] %vm266_vm2, %v526_v24 }
 0x246   : > { %837 = shalt.err (!%p834_p5)
}
 0x247   : > { %s838_s21 = scalar_lea.hbm %s1119_s29, 128  ;;  %s842_s27 = scalar_lea.hbm %s1172_s3, 256 }
 0x248   : > { %p839_p9 = scmp.ne.s32.totalorder %s1119_s29, %s838_s21  ;;  %p843_p7 = scmp.lt.u32.totalorder %s1119_s29, %s1172_s3 }
 0x249   : > { %p844_p3 = scmp.lt.u32.totalorder %s842_s27, %s838_s21  ;;  %p846_p4 = scmp.lt.u32.totalorder %s838_s21, %s1119_s29 }
 0x24a   : > { %p840_p1 = pnand %p839_p9, %p1035_p10 }
 0x24b   : > { %p845_p13 = por %p844_p3, %p843_p7 }
 0x24c   : > { %p841_p2 = pneg %p840_p1 }
 0x24d   : > { %p847_p6 = por %p846_p4, %p845_p13 }
 0x24f   : > { %p848_p8 = pnand %p847_p6, %p841_p2 }
 0x251   : > { %851 = shalt.err (!%p848_p8)
}
 0x252   : > { %695 = dma.vmem_to_hbm [thread:$0]  (%p1035_p10), %s1121_s10, 128, %s1119_s29, %s544_s6  }
 0x253 PF: > { %s570_s22 = sand.u32 1, %s890_s12   ;;  %p1190_p12 = scmp.ne.s32.totalorder %s1180_s23, 0 }
 0x254   : > { %p1191_p11 = scmp.ge.s32.totalorder %s910_s17, 2  ;;  %s571_s24 = scalar_lea.sflag [#allocation6], %s570_s22 }
 0x256   : > { %p706_p0 = pnand %p1191_p11, %p1190_p12 }
 0x258   : > { %885 = dma.done.wait (!%p706_p0), %s571_s24, 128  }
 0x259   : > { %887 = vsyncadd (!%p706_p0), %s571_s24, 4294967168  ;;  %s20_s17 = sadd.s32 1, %s910_s17   ;;  %s1192_s12 = smov %s894_s13 }
 0x25a   : > { %p17_p5 = scmp.ge.s32.totalorder %s20_s17, 4   ;;  %s1193_s13 = smov %s898_s14 }
 0x25b   : > { %s1194_s14 = smov %s1044_s5  ;;  %s1195_s15 = smov %s906_s16 }
 0x25c   : > { %s1196_s16 = smov %s1198_s28  ;;  %19 = sbr.rel (!%p17_p5) target bundleno = 7 (0x7), region = 88 }
 0x263   :  { %576 = vsyncpa [#allocation5], 1 }
 0x264   :  { %578 = vsyncpa [#allocation5 + $0x1], 1 }
 0x265   :  { %579 = vsyncpa [#allocation8], 1 }
 0x266   :  { %580 = vsyncpa [#allocation6], 1 }
 0x267   :  { %582 = vsyncpa [#allocation6 + $0x1], 1 }

</bundles_post_ra>
